<compile_context>
chip_gen: v7x
topology: tpu7x:2x2x1
jax: 0.10.0
libtpu: 0.0.40
codegen_flags: <defaults>
</compile_context>

<pallas_src>
import functools

import jax
import jax.numpy as jnp
from jax.experimental import pallas as pl
from jax.experimental.pallas import tpu as pltpu

LN_EPS = 1e-6


def _round_up(x, m):
    return (x + m - 1) // m * m


def _residual_kernel(dropout_rate, block_rows, hidden,
                     seed_ref,                       # SMEM scalar prefetch (1,) i32
                     x_ref, params_ref, w_ref,
                     o_ref):
    # ---- load tile ---------------------------------------------------------
    x = x_ref[...]                                   # (R, H) f32
    gamma = params_ref[0:1, :]                       # (1, H)
    beta = params_ref[1:2, :]                        # (1, H)
    bias = params_ref[2:3, :]                        # (1, H)

    # ---- LayerNorm over the feature axis (f32 stats) -------------------------
    inv_h = jnp.float32(1.0 / hidden)
    mean = jnp.sum(x, axis=-1, keepdims=True) * inv_h
    cent = x - mean
    var = jnp.sum(cent * cent, axis=-1, keepdims=True) * inv_h
    xn = cent * jax.lax.rsqrt(var + LN_EPS)          # rsqrt -> EUP slot
    xn = xn * gamma + beta                           # (R, H)

    # ---- sublayer: Linear(H -> H); bf16 operands, f32 accumulate (MXU) -------
    y = jnp.dot(xn.astype(jnp.bfloat16), w_ref[...],
                preferred_element_type=jnp.float32)
    y = y + bias

    # ---- dropout (inverted, training semantics) -----------------------------
    if dropout_rate > 0.0:
        # Counter-based hash (murmur3 finalizer) over (global_row, col) + seed.
        row0 = pl.program_id(0) * block_rows
        rows_i = jax.lax.broadcasted_iota(jnp.int32, y.shape, 0) + row0
        cols_i = jax.lax.broadcasted_iota(jnp.int32, y.shape, 1)
        h = (rows_i * hidden + cols_i).astype(jnp.uint32)
        h = h + seed_ref[0].astype(jnp.uint32)
        h = h ^ (h >> 16)
        h = h * jnp.uint32(0x85EBCA6B)
        h = h ^ (h >> 13)
        h = h * jnp.uint32(0xC2B2AE35)
        h = h ^ (h >> 16)
        # Integer threshold compare: keep with probability (1 - p).
        thresh = jnp.uint32(min(int(dropout_rate * 4294967296.0), 4294967295))
        keep = h >= thresh
        scale = jnp.float32(1.0 / (1.0 - dropout_rate))
        y = jnp.where(keep, y * scale, jnp.float32(0.0))

    # ---- residual add --------------------------------------------------------
    o_ref[...] = x + y


def residual_connection(x, gamma, beta, w, b, *, dropout_rate=0.0, seed=0,
                        target_block_rows=512):
    """x: (B, S, H) f32. Returns x + dropout(Linear(LayerNorm(x)))."""
    B, S, H = x.shape
    rows = B * S
    x2 = x.reshape(rows, H).astype(jnp.float32)

    # Row tiling: multiple of 8, up to `target_block_rows`; pad rows so the
    # grid divides evenly (padded rows are sliced off afterwards).
    block_rows = min(target_block_rows, _round_up(rows, 8))
    rows_p = _round_up(rows, block_rows)
    if rows_p != rows:
        x2 = jnp.pad(x2, ((0, rows_p - rows), (0, 0)))

    # Stacked small parameters: one resident (3, H) slab instead of 3 vectors.
    params = jnp.stack([gamma.reshape(H), beta.reshape(H), b.reshape(H)],
                       axis=0).astype(jnp.float32)
    w_bf = w.astype(jnp.bfloat16)        # resident weight in bf16 (half VMEM)
    seed_arr = jnp.array([seed], dtype=jnp.int32)

    grid = (rows_p // block_rows,)
    kernel = functools.partial(_residual_kernel, float(dropout_rate),
                               block_rows, H)

    # VMEM budget: double-buffered x/out tiles + resident bf16 weight + params,
    # with 2x headroom (clamped to [32 MiB, 100 MiB]).
    vmem_bytes = (2 * block_rows * H * 4      # x tiles (double-buffered)
                  + 2 * block_rows * H * 4    # out tiles (double-buffered)
                  + H * H * 2                 # w (bf16, resident)
                  + 3 * H * 4)                # gamma / beta / bias slab
    vmem_limit = int(min(100 * 1024 * 1024,
                         max(32 * 1024 * 1024, 2 * vmem_bytes)))

    cost = pl.CostEstimate(
        flops=2 * rows_p * H * H,
        transcendentals=rows_p,               # one rsqrt per row
        bytes_accessed=rows_p * H * 4 * 2 + H * H * 2 + 3 * H * 4)

    # TODO(synk): for H < 128 the output stores are lane-masked (vst.msk); a
    # lane-dense layout would need H padded to 128 with LN masking — real
    # transformer widths (H >= 128, multiple of 128) already hit the dense path.
    out2 = pl.pallas_call(
        kernel,
        out_shape=jax.ShapeDtypeStruct((rows_p, H), jnp.float32),
        grid_spec=pltpu.PrefetchScalarGridSpec(
            num_scalar_prefetch=1,
            grid=grid,
            in_specs=[
                pl.BlockSpec((block_rows, H), lambda i, seed: (i, 0)),   # x
                pl.BlockSpec((3, H),          lambda i, seed: (0, 0)),   # params
                pl.BlockSpec((H, H),          lambda i, seed: (0, 0)),   # w (bf16)
            ],
            out_specs=pl.BlockSpec((block_rows, H), lambda i, seed: (i, 0)),
        ),
        compiler_params=pltpu.CompilerParams(
            dimension_semantics=("parallel",),
            vmem_limit_bytes=vmem_limit),
        cost_estimate=cost,
    )(seed_arr, x2, params, w_bf)

    if rows_p != rows:
        out2 = out2[:rows]
    return out2.reshape(B, S, H)


if __name__ == "__main__":
    # Small shapes implied by the forward: (batch, seq, hidden)
    B, S, H = 2, 8, 32
    key = jax.random.PRNGKey(0)
    kx, kw, kb = jax.random.split(key, 3)

    x = jax.random.normal(kx, (B, S, H), dtype=jnp.float32)
    gamma = jnp.ones((H,), dtype=jnp.float32)
    beta = jnp.zeros((H,), dtype=jnp.float32)
    w = jax.random.normal(kw, (H, H), dtype=jnp.float32) * 0.05
    b = jax.random.normal(kb, (H,), dtype=jnp.float32) * 0.05

    # Eval-mode (dropout off) correctness check against a pure-JAX reference.
    out_eval = residual_connection(x, gamma, beta, w, b, dropout_rate=0.0)
    jax.block_until_ready(out_eval)

    x2 = x.reshape(-1, H)
    mean = jnp.mean(x2, axis=-1, keepdims=True)
    var = jnp.mean((x2 - mean) ** 2, axis=-1, keepdims=True)
    xn = (x2 - mean) * jax.lax.rsqrt(var + LN_EPS) * gamma + beta
    ref = (x2 + jnp.dot(xn.astype(jnp.bfloat16), w.astype(jnp.bfloat16),
                        preferred_element_type=jnp.float32) + b)
    ref = ref.reshape(B, S, H)
    assert jnp.allclose(out_eval, ref, atol=2e-2, rtol=2e-2)

    # Training-mode inverted dropout path.
    out_train = residual_connection(x, gamma, beta, w, b,
                                    dropout_rate=0.1, seed=1234)
    jax.block_until_ready(out_train)
    assert out_train.shape == (B, S, H) and out_train.dtype == jnp.float32
    assert bool(jnp.all(jnp.isfinite(out_train)))
    # Dropout must only differ from eval where elements were dropped (zeros of
    # the sublayer branch) or rescaled; sanity-check it stays close in norm.
    assert bool(jnp.isfinite(jnp.linalg.norm(out_train - out_eval)))
    print("KERNEL_OK")
</pallas_src>

<mosaic_0001>
module attributes {stable_mosaic.version = 11 : i64} {
  func.func @_residual_kernel(%arg0: i32, %arg1: memref<1xi32, #tpu.memory_space<smem>>, %arg2: memref<16x32xf32, #tpu.memory_space<vmem>>, %arg3: memref<3x32xf32, #tpu.memory_space<vmem>>, %arg4: memref<32x32xbf16, #tpu.memory_space<vmem>>, %arg5: memref<16x32xf32, #tpu.memory_space<vmem>>) attributes {dimension_semantics = [#tpu.dimension_semantics<parallel>], iteration_bounds = array<i64: 1>, scalar_prefetch = 1 : i64, scratch_operands = 0 : i64, tpu.core_type = #tpu.core_type<tc>, window_params = [{transform_indices = @transform_0, window_bounds = array<i64: 16, 32>}, {pipeline_mode = #tpu.pipeline_mode<synchronous>, transform_indices = @transform_1, window_bounds = array<i64: 3, 32>}, {pipeline_mode = #tpu.pipeline_mode<synchronous>, transform_indices = @transform_2, window_bounds = array<i64: 32, 32>}, {transform_indices = @transform_3, window_bounds = array<i64: 16, 32>}]} {
    %c0 = arith.constant 0 : index
    %c0_0 = arith.constant 0 : index
    %0 = vector.load %arg2[%c0, %c0_0] : memref<16x32xf32, #tpu.memory_space<vmem>>, vector<16x32xf32>
    %c0_1 = arith.constant 0 : index
    %c0_2 = arith.constant 0 : index
    %1 = vector.load %arg3[%c0_1, %c0_2] : memref<3x32xf32, #tpu.memory_space<vmem>>, vector<1x32xf32>
    %c1 = arith.constant 1 : index
    %c0_3 = arith.constant 0 : index
    %2 = vector.load %arg3[%c1, %c0_3] : memref<3x32xf32, #tpu.memory_space<vmem>>, vector<1x32xf32>
    %c2 = arith.constant 2 : index
    %c0_4 = arith.constant 0 : index
    %3 = vector.load %arg3[%c2, %c0_4] : memref<3x32xf32, #tpu.memory_space<vmem>>, vector<1x32xf32>
    %cst = arith.constant dense<0.000000e+00> : vector<16xf32>
    %4 = vector.multi_reduction <add>, %0, %cst [1] : vector<16x32xf32> to vector<16xf32>
    %5 = vector.shape_cast %4 : vector<16xf32> to vector<16x1xf32>
    %cst_5 = arith.constant 3.125000e-02 : f32
    %6 = vector.broadcast %cst_5 : f32 to vector<16x1xf32>
    %7 = arith.mulf %5, %6 : vector<16x1xf32>
    %8 = vector.broadcast %7 : vector<16x1xf32> to vector<16x32xf32>
    %9 = arith.subf %0, %8 : vector<16x32xf32>
    %10 = arith.mulf %9, %9 : vector<16x32xf32>
    %cst_6 = arith.constant dense<0.000000e+00> : vector<16xf32>
    %11 = vector.multi_reduction <add>, %10, %cst_6 [1] : vector<16x32xf32> to vector<16xf32>
    %12 = vector.shape_cast %11 : vector<16xf32> to vector<16x1xf32>
    %cst_7 = arith.constant 3.125000e-02 : f32
    %13 = vector.broadcast %cst_7 : f32 to vector<16x1xf32>
    %14 = arith.mulf %12, %13 : vector<16x1xf32>
    %cst_8 = arith.constant 9.99999997E-7 : f32
    %15 = vector.broadcast %cst_8 : f32 to vector<16x1xf32>
    %16 = arith.addf %14, %15 : vector<16x1xf32>
    %17 = math.rsqrt %16 : vector<16x1xf32>
    %18 = vector.broadcast %17 : vector<16x1xf32> to vector<16x32xf32>
    %19 = arith.mulf %9, %18 : vector<16x32xf32>
    %20 = vector.broadcast %1 : vector<1x32xf32> to vector<16x32xf32>
    %21 = arith.mulf %19, %20 : vector<16x32xf32>
    %22 = vector.broadcast %2 : vector<1x32xf32> to vector<16x32xf32>
    %23 = arith.addf %21, %22 : vector<16x32xf32>
    %24 = arith.truncf %23 : vector<16x32xf32> to vector<16x32xbf16>
    %c0_9 = arith.constant 0 : index
    %c0_10 = arith.constant 0 : index
    %25 = vector.load %arg4[%c0_9, %c0_10] : memref<32x32xbf16, #tpu.memory_space<vmem>>, vector<32x32xbf16>
    %cst_11 = arith.constant dense<0.000000e+00> : vector<16x32xf32>
    %26 = tpu.matmul %24, %25, %cst_11 {dimension_numbers = #tpu.dot_dimension_numbers<[1], [0], [0], [1], [0, 0, 1, 1], [], []>} : vector<16x32xbf16>, vector<32x32xbf16>, vector<16x32xf32> -> vector<16x32xf32>
    %27 = vector.broadcast %3 : vector<1x32xf32> to vector<16x32xf32>
    %28 = arith.addf %26, %27 : vector<16x32xf32>
    %29 = arith.addf %0, %28 : vector<16x32xf32>
    %c0_12 = arith.constant 0 : index
    %c0_13 = arith.constant 0 : index
    %30 = vector.load %arg5[%c0_12, %c0_13] : memref<16x32xf32, #tpu.memory_space<vmem>>, vector<16x32xf32>
    tpu.vector_store %arg5[%c0_12, %c0_13], %29 {strides = array<i32>} : memref<16x32xf32, #tpu.memory_space<vmem>>, vector<16x32xf32>,
    return
  }
  func.func @transform_0(%arg0: i32, %arg1: memref<1xi32, #tpu.memory_space<smem>>) -> (i32, i32) {
    %c0_i32 = arith.constant 0 : i32
    %c0_i32_0 = arith.constant 0 : i32
    return %arg0, %c0_i32 : i32, i32
  }
  func.func @transform_1(%arg0: i32, %arg1: memref<1xi32, #tpu.memory_space<smem>>) -> (i32, i32) {
    %c0_i32 = arith.constant 0 : i32
    %c0_i32_0 = arith.constant 0 : i32
    %c0_i32_1 = arith.constant 0 : i32
    return %c0_i32, %c0_i32_0 : i32, i32
  }
  func.func @transform_2(%arg0: i32, %arg1: memref<1xi32, #tpu.memory_space<smem>>) -> (i32, i32) {
    %c0_i32 = arith.constant 0 : i32
    %c0_i32_0 = arith.constant 0 : i32
    %c0_i32_1 = arith.constant 0 : i32
    return %c0_i32, %c0_i32_0 : i32, i32
  }
  func.func @transform_3(%arg0: i32, %arg1: memref<1xi32, #tpu.memory_space<smem>>) -> (i32, i32) {
    %c0_i32 = arith.constant 0 : i32
    %c0_i32_0 = arith.constant 0 : i32
    return %arg0, %c0_i32 : i32, i32
  }
}

</mosaic_0001>

<bundles_post_ra>
// kernel: tpu_custom_call.1
= control target key start
LH: loop header
LB: loop body
LE: loop exit
PB: predicated region body
PF: predicated region fallthrough
CT: control target
= control target key end

     0   :  { %10 = vsyncpa [#allocation5], 0  ;;  %s373_s0 = inlined_call_operand.<no memory space> [shape: s32[1], index: 0, kind: input, shape index: {}]   ;;  %s374_s1 = inlined_call_operand.hbm [shape: f32[16,32], index: 1, kind: input, shape index: {}]   ;;  %s375_s2 = inlined_call_operand.vmem [shape: f32[3,32], index: 2, kind: input, shape index: {}]   ;;  %s376_s3 = inlined_call_operand.hbm [shape: bf16[32,32], index: 3, kind: input, shape index: {}]   ;;  %s377_s4 = inlined_call_operand.hbm [shape: f32[16,32], index: 4, kind: output, shape index: {}]  }
   0x1   :  { %11 = vsyncpa [#allocation8], 0 }
   0x2   :  { %12 = vsyncpa [#allocation6], 0  ;;  %s281_s15 = smov [#allocation4]   ;;  %s209_s18 = scalar_lea.hbm %s374_s1, 256 }
   0x3   :  { %s18_s16 = sshll.u32 %s281_s15, 4  ;;  %p210_p0 = scmp.ne.s32.totalorder %s374_s1, %s209_s18  ;;  %s19_s16 = int_to_ptr.vmem [resolvable:$true] %s18_s16 }
   0x4   :  { %p213_p1 = scmp.lt.u32.totalorder %s209_s18, %s374_s1 }
   0x6   :  { %p215_p2 = pnand %p213_p1, %p210_p0 }
   0x8   :  { %218 = shalt.err (!%p215_p2)
}
   0x9   :  { %s219_s23 = scalar_lea.vmem %s19_s16, 256  ;;  %p224_p4 = scmp.lt.s32.totalorder %s19_s16, %s19_s16 }
   0xa   :  { %p220_p3 = scmp.ne.s32.totalorder %s19_s16, %s219_s23  ;;  %p225_p5 = scmp.lt.s32.totalorder %s219_s23, %s219_s23 }
   0xc   :  { %p226_p6 = por %p225_p5, %p224_p4 }
   0xe   :  { %p227_p7 = pnand %p226_p6, %p220_p3 }
  0x10   :  { %230 = shalt.err (!%p227_p7)
}
  0x11   :  { %s282_s24 = smov 128   ;;  %s283_s25 = smov 8  }
  0x12   :  { %24 = dma.hbm_to_vmem [thread:$0]  %s374_s1, 256, %s19_s16, [#allocation5], %s282_s24, %s282_s24, %s283_s25  }
  0x13   :  { %s284_s28 = smov [#allocation7]   ;;  %s231_s6 = scalar_lea.hbm %s376_s3, 256 }
  0x14   :  { %s32_s29 = sshll.u32 %s284_s28, 4  ;;  %p232_p8 = scmp.ne.s32.totalorder %s376_s3, %s231_s6  ;;  %s33_s29 = int_to_ptr.vmem [resolvable:$true] %s32_s29 }
  0x15   :  { %p235_p9 = scmp.lt.u32.totalorder %s231_s6, %s376_s3 }
  0x17   :  { %p237_p10 = pnand %p235_p9, %p232_p8 }
  0x19   :  { %240 = shalt.err (!%p237_p10)
}
  0x1a   :  { %s241_s11 = scalar_lea.vmem %s33_s29, 256  ;;  %p246_p12 = scmp.lt.s32.totalorder %s33_s29, %s33_s29 }
  0x1b   :  { %p242_p11 = scmp.ne.s32.totalorder %s33_s29, %s241_s11  ;;  %p247_p13 = scmp.lt.s32.totalorder %s241_s11, %s241_s11 }
  0x1d   :  { %p248_p0 = por %p247_p13, %p246_p12 }
  0x1f   :  { %p249_p1 = pnand %p248_p0, %p242_p11 }
  0x21   :  { %252 = shalt.err (!%p249_p1)
}
  0x22   :  { %s285_s1 = smov 64   ;;  %s286_s12 = smov 4  }
  0x23   :  { %38 = dma.hbm_to_vmem [thread:$0]  %s376_s3, 256, %s33_s29, [#allocation8], %s285_s1, %s285_s1, %s286_s12  }
  0x24   :  { %275 = dma.done.wait [#allocation5], 256  }
  0x25   :  { %276 = vsyncadd [#allocation5], 4294967040 }
  0x26   :  { %277 = dma.done.wait [#allocation8], 256  }
  0x27   :  { %278 = vsyncadd [#allocation8], 4294967040  ;;  %vm51_vm0 = vcmask 261120   ;;  %v46_v0 = vld [vmem:[#allocation4] sm:$0xff]  ;;  %v47_v1 = vld [vmem:[#allocation4 + $0x8] sm:$0xff]  ;;  %v287_v15 = vmov 0.0  }
  0x28   :  { %v52_v2 = vsel %vm51_vm0, %v46_v0, 0.0  ;;  %v55_v3 = vsel %vm51_vm0, %v47_v1, 0.0  ;;  %v203_v14 = vld [vmem:[#allocation7] sm:$0xff]   ;;  %186 = vmatprep.subr.bf16.mxu0 %v287_v15  ;;  %v204_v16 = vld [vmem:[#allocation7 + $0x8] sm:$0xff]   ;;  %vm288_vm1 = vmmov 0   ;;  %s289_s19 = smov [#allocation9]  }
  0x29   :  { %53 = vadd.xlane.f32.xlu0 %v52_v2  ;;  %187 = vmatpush3.bf16.msra.mxu0 %v203_v14  ;;  %v177_v25 = vld [vmem:[%s375_s2] ss:$0 sm:$0xff]  ;;  %v178_v29 = vld [vmem:[%s375_s2 + $0x1] ss:$0 sm:$0xff]  ;;  %v179_v34 = vld [vmem:[%s375_s2 + $0x2] ss:$0 sm:$0xff] }
  0x2a   :  { %190 = vmatprep.mubr.msk.bf16.mxu0 %vm288_vm1, %v287_v15  ;;  %188 = vmatprep.subr.bf16.mxu0 %v287_v15  ;;  %s164_s20 = sshll.u32 %s289_s19, 4  ;;  %s165_s20 = int_to_ptr.vmem [resolvable:$true] %s164_s20 }
  0x2b   :  { %s253_s21 = scalar_lea.vmem %s165_s20, 256  ;;  %p258_p3 = scmp.lt.s32.totalorder %s165_s20, %s165_s20 }
  0x2c   :  { %p254_p2 = scmp.ne.s32.totalorder %s165_s20, %s253_s21  ;;  %p259_p4 = scmp.lt.s32.totalorder %s253_s21, %s253_s21 }
  0x2d   :  { %56 = vadd.xlane.f32.xlu0 %v55_v3  ;;  %189 = vmatpush3.bf16.msra.mxu0 %v204_v16 }
  0x2e   :  { %p260_p5 = por %p259_p4, %p258_p3 }
  0x30   :  { %p261_p6 = pnand %p260_p5, %p254_p2 }
  0xb6   :  { %v54_v4 = vpop.xlane.xlu0 %53 }
  0xb7   :  { %v58_v5 = vmul.f32 0.03125, %v54_v4 }
  0xb9   :  { %v60_v6 = vsub.f32 %v46_v0, %v58_v5 }
  0xba   :  { %v57_v7 = vpop.xlane.xlu0 %56 }
  0xbb   :  { %v59_v8 = vmul.f32 0.03125, %v57_v7  ;;  %v62_v9 = vmul.f32 %v60_v6, %v60_v6 }
  0xbd   :  { %v61_v10 = vsub.f32 %v47_v1, %v59_v8  ;;  %v64_v11 = vsel %vm51_vm0, %v62_v9, 0.0 }
  0xbe   :  { %65 = vadd.xlane.f32.xlu1 %v64_v11 }
  0xbf   :  { %v63_v12 = vmul.f32 %v61_v10, %v61_v10 }
  0xc1   :  { %v67_v13 = vsel %vm51_vm0, %v63_v12, 0.0 }
  0xc2   :  { %68 = vadd.xlane.f32.xlu1 %v67_v13 }
 0x14b   :  { %v66_v17 = vpop.xlane.xlu1 %65 }
 0x14c   :  { %v70_v18 = vmul.f32 0.03125, %v66_v17 }
 0x14e   :  { %v72_v19 = vadd.f32 1e-06, %v70_v18 }
 0x14f   :  { %v69_v20 = vpop.xlane.xlu1 %68 }
 0x150   :  { %205 = vrsqrt.f32 %v72_v19  ;;  %v71_v21 = vmul.f32 0.03125, %v69_v20 }
 0x152   :  { %v73_v22 = vadd.f32 1e-06, %v71_v21 }
 0x154   :  { %207 = vrsqrt.f32 %v73_v22 }
 0x15a   :  { %v206_v23 = vpop.eup %205 }
 0x15b   :  { %v76_v24 = vmul.f32 %v206_v23, %v60_v6 }
 0x15d   :  { %v82_v28 = vmul.f32 %v177_v25, %v76_v24 }
 0x15e   :  { %v208_v26 = vpop.eup %207 }
 0x15f   :  { %v77_v27 = vmul.f32 %v208_v26, %v61_v10  ;;  %v88_v31 = vadd.f32 %v178_v29, %v82_v28 }
 0x161   :  { %v83_v30 = vmul.f32 %v177_v25, %v77_v27 }
 0x163   :  { %v89_v32 = vadd.f32 %v178_v29, %v83_v30 }
 0x165   :  { %v90_v33 = vpack.c.bf16 %v89_v32, %v88_v31 }
 0x167   :  { %191 = vmatmul.mubr.msk.bf16.vlgmr.msra.gmra.mrb[0].mxu0 %vm51_vm0, %v90_v33 }
 0x23a   :  { %v148_v35 = vpop.f32.mrb[0].mxu0 }
 0x23b   :  { %v149_v36 = vadd.f32 %v179_v34, %v148_v35  ;;  %v192_v37 = vpop.f32.mrb[1].mxu0 }
 0x23c   :  { %v151_v38 = vpop.f32.mrb[2].mxu0 }
 0x23d   :  { %v155_v39 = vadd.f32 %v149_v36, %v46_v0  ;;  %v152_v40 = vadd.f32 %v179_v34, %v151_v38  ;;  %v193_v41 = vpop.f32.mrb[3].mxu0 }
 0x23f   :  { %157 = vst.msk [vmem:[#allocation9] sm:$0xff] %vm51_vm0, %v155_v39  ;;  %v156_v42 = vadd.f32 %v152_v40, %v47_v1 }
 0x241   :  { %158 = vst.msk [vmem:[#allocation9 + $0x8] sm:$0xff] %vm51_vm0, %v156_v42 }
 0x242   :  { %264 = shalt.err (!%p261_p6)
}
 0x243   :  { %s265_s23 = scalar_lea.hbm %s377_s4, 256 }
 0x244   :  { %p266_p7 = scmp.ne.s32.totalorder %s377_s4, %s265_s23  ;;  %p269_p8 = scmp.lt.u32.totalorder %s265_s23, %s377_s4 }
 0x246   :  { %p271_p9 = pnand %p269_p8, %p266_p7 }
 0x248   :  { %274 = shalt.err (!%p271_p9)
}
 0x249   :  { %170 = dma.vmem_to_hbm [thread:$0]  %s165_s20, 256, %s377_s4, [#allocation6], %s282_s24, %s282_s24, %s283_s25  }
 0x24a   :  { %279 = dma.done.wait [#allocation6], 256  }
 0x24b   :  { %280 = vsyncadd [#allocation6], 4294967040 }
 0x24c   :  { %174 = vsyncpa [#allocation5], 1 }
 0x24d   :  { %175 = vsyncpa [#allocation8], 1 }
 0x24e   :  { %176 = vsyncpa [#allocation6], 1 }

</bundles_post_ra>
